<compile_context>
chip_gen: v6e
topology: v6e:2x2x1
jax: 0.10.0
libtpu: 0.0.40
codegen_flags: <defaults>
</compile_context>

<pallas_src>
import functools
import math

import jax
import jax.numpy as jnp
from jax.experimental import pallas as pl
from jax.experimental.pallas import tpu as pltpu

LANE = 128
SUBLANE = 8


def _round_up(x, m):
    return (x + m - 1) // m * m


def _critic_kernel(x_ref, a_ref, w1x_ref, w1a_ref, b1_ref,
                   w2_ref, b2_ref, w3_ref, b3_ref, out_ref):
    """Fused 3-layer MLP with the obs/act concat folded into fc1.

    h1  = relu(x @ W1x + a @ W1a + b1)     (concat fused as a split matmul)
    h2  = relu(h1 @ W2 + b2)
    out = sum(h2 * w3_row, axis=-1) + b3   (VPU mul + XLU lane reduction,
                                            narrow (tb, 1) store)

    Matmul operands are bf16 (MXU-native), accumulation and all element-wise
    math stay in f32.
    """
    x = x_ref[...].astype(jnp.bfloat16)
    a = a_ref[...].astype(jnp.bfloat16)

    h1 = jnp.dot(x, w1x_ref[...], preferred_element_type=jnp.float32)
    h1 = h1 + jnp.dot(a, w1a_ref[...], preferred_element_type=jnp.float32)
    h1 = jnp.maximum(h1 + b1_ref[...], 0.0)                      # (TB, HP) f32

    h2 = jnp.dot(h1.astype(jnp.bfloat16), w2_ref[...],
                 preferred_element_type=jnp.float32)
    h2 = jnp.maximum(h2 + b2_ref[...], 0.0)                      # (TB, HP) f32

    # fc3: hidden -> 1.  Elementwise multiply (VPU) + lane reduction (XLU);
    # padded lanes of h2 / w3_row are zero so they do not contribute.
    out = jnp.sum(h2 * w3_ref[...], axis=-1, keepdims=True) + b3_ref[0, 0]
    out_ref[...] = out.astype(out_ref.dtype)                     # (TB, 1)


@functools.partial(jax.jit, static_argnames=("block_b",))
def critic_forward(x, a, kernel_params, *, block_b=2048):
    """x: (B, obs_total), a: (B, act_total) -> (B, 1) f32.

    Inputs may be f32 or bf16; they are used as matmul operands in bf16 either
    way (cast happens inside the kernel, never as a separate wrapper pass).
    """
    w1x, w1a, b1, w2, b2, w3_row, b3 = kernel_params
    B, obs_dim = x.shape
    act_dim = a.shape[1]
    HP = w2.shape[0]          # hidden, padded to 128 lanes

    # Pad batch only to the sublane multiple (block first dim must be a
    # multiple of 8); never round up to a multiple of the batch tile.
    B_pad = _round_up(max(B, SUBLANE), SUBLANE)
    if B_pad != B:
        x = jnp.pad(x, ((0, B_pad - B), (0, 0)))
        a = jnp.pad(a, ((0, B_pad - B), (0, 0)))

    tb = min(block_b, B_pad)
    # Ensure >= 2 grid steps when the batch allows it so the "parallel" axis
    # shards across both TensorCores on v7x (harmless on v5e/v6e).
    if B_pad <= tb and B_pad >= 2 * SUBLANE:
        tb = _round_up(pl.cdiv(B_pad, 2), SUBLANE)
    grid = (pl.cdiv(B_pad, tb),)   # partial last block handled by Pallas

    flops = (2 * B_pad * HP * (obs_dim + act_dim + HP)   # fc1 + fc2 (MXU)
             + 2 * B_pad * HP)                           # fc3 mul + reduce
    bytes_accessed = (
        B_pad * (obs_dim + act_dim) * x.dtype.itemsize   # activations in
        + B_pad * 4                                      # (B, 1) output
        + sum(int(p.size) * p.dtype.itemsize for p in kernel_params))
    cost = pl.CostEstimate(flops=flops, transcendentals=0,
                           bytes_accessed=bytes_accessed)

    out = pl.pallas_call(
        _critic_kernel,
        out_shape=jax.ShapeDtypeStruct((B_pad, 1), jnp.float32),
        grid=grid,
        in_specs=[
            pl.BlockSpec((tb, obs_dim), lambda i: (i, 0)),   # x tile
            pl.BlockSpec((tb, act_dim), lambda i: (i, 0)),   # a tile
            pl.BlockSpec((obs_dim, HP), lambda i: (0, 0)),   # W1_obs (resident)
            pl.BlockSpec((act_dim, HP), lambda i: (0, 0)),   # W1_act (resident)
            pl.BlockSpec((1, HP), lambda i: (0, 0)),         # b1
            pl.BlockSpec((HP, HP), lambda i: (0, 0)),        # W2
            pl.BlockSpec((1, HP), lambda i: (0, 0)),         # b2
            pl.BlockSpec((1, HP), lambda i: (0, 0)),         # W3 row (f32)
            pl.BlockSpec((1, 1), lambda i: (0, 0)),          # b3 scalar
        ],
        out_specs=pl.BlockSpec((tb, 1), lambda i: (i, 0)),
        compiler_params=pltpu.CompilerParams(
            dimension_semantics=("parallel",),               # v7x 2-TC sharding
            vmem_limit_bytes=48 << 20,
        ),
        cost_estimate=cost,
    )(x, a, w1x, w1a, b1, w2, b2, w3_row, b3)

    return out[:B]


def init_params(key, obs_dim, act_dim, hidden):
    """nn.Linear-style init, weights stored (in, out) so y = x @ W + b."""
    def linear(k, fan_in, fan_out):
        kw, kb = jax.random.split(k)
        bound = 1.0 / math.sqrt(fan_in)
        w = jax.random.uniform(kw, (fan_in, fan_out), jnp.float32, -bound, bound)
        b = jax.random.uniform(kb, (1, fan_out), jnp.float32, -bound, bound)
        return w, b

    k1, k2, k3 = jax.random.split(key, 3)
    w1, b1 = linear(k1, obs_dim + act_dim, hidden)
    w2, b2 = linear(k2, hidden, hidden)
    w3, b3 = linear(k3, hidden, 1)
    return (w1, b1, w2, b2, w3, b3)


def prepare_kernel_params(params, obs_dim, act_dim):
    """One-time transform: split W1 along the concat axis, zero-pad the hidden
    dim to 128 lanes, cast matmul weights to bf16 (at-rest storage).  W3 is
    kept as an f32 (1, HP) row (VPU/XLU fc3) and biases stay f32."""
    w1, b1, w2, b2, w3, b3 = params
    H = w1.shape[1]
    HP = _round_up(H, LANE)

    w1x = jnp.pad(w1[:obs_dim], ((0, 0), (0, HP - H))).astype(jnp.bfloat16)
    w1a = jnp.pad(w1[obs_dim:], ((0, 0), (0, HP - H))).astype(jnp.bfloat16)
    b1p = jnp.pad(b1, ((0, 0), (0, HP - H)))
    w2p = jnp.pad(w2, ((0, HP - H), (0, HP - H))).astype(jnp.bfloat16)
    b2p = jnp.pad(b2, ((0, 0), (0, HP - H)))
    w3r = jnp.pad(w3, ((0, HP - H), (0, 0))).T          # (1, HP) f32 row
    return (w1x, w1a, b1p, w2p, b2p, w3r, b3)           # b3: (1, 1) f32


if __name__ == "__main__":
    # Small config consistent with the module's __init__:
    #   fc1 in = obs_size*max_drones + action_size*max_drones + max_drones
    observation_space_size = 8
    action_space_size = 4
    max_drone_count = 3
    critic_model_size = 32
    batch = 4

    obs_total = observation_space_size * max_drone_count + max_drone_count  # 27
    act_total = action_space_size * max_drone_count                          # 12

    key = jax.random.PRNGKey(0)
    kx, ka, kp = jax.random.split(key, 3)
    x = jax.random.normal(kx, (batch, obs_total), jnp.float32)
    a = jax.random.normal(ka, (batch, act_total), jnp.float32)

    params = init_params(kp, obs_total, act_total, critic_model_size)
    kparams = prepare_kernel_params(params, obs_total, act_total)

    out = critic_forward(x, a, kparams)
    out = jax.block_until_ready(out)
    assert out.shape == (batch, 1)

    # Pure-f32 reference (original Critic math) — loose tolerance (bf16 MXU ops).
    w1, b1, w2, b2, w3, b3 = params
    xa = jnp.concatenate([x, a], axis=1)
    ref_f32 = jnp.maximum(xa @ w1 + b1, 0.0)
    ref_f32 = jnp.maximum(ref_f32 @ w2 + b2, 0.0)
    ref_f32 = ref_f32 @ w3 + b3

    # bf16-matched reference (same cast points as the kernel; fc3 in f32).
    bf = jnp.bfloat16
    h1 = jnp.maximum(
        jnp.dot(x.astype(bf), w1[:obs_total].astype(bf),
                preferred_element_type=jnp.float32)
        + jnp.dot(a.astype(bf), w1[obs_total:].astype(bf),
                  preferred_element_type=jnp.float32)
        + b1, 0.0)
    h2 = jnp.maximum(
        jnp.dot(h1.astype(bf), w2.astype(bf),
                preferred_element_type=jnp.float32) + b2, 0.0)
    ref_bf16 = h2 @ w3 + b3

    assert jnp.allclose(out, ref_bf16, atol=2e-4, rtol=2e-4)
    assert jnp.allclose(out, ref_f32, atol=5e-2, rtol=5e-2)

    print("KERNEL_OK")
</pallas_src>

<mosaic_0001>
module attributes {stable_mosaic.version = 11 : i64} {
  func.func @_critic_kernel(%arg0: i32, %arg1: memref<8x27xf32, #tpu.memory_space<vmem>>, %arg2: memref<8x12xf32, #tpu.memory_space<vmem>>, %arg3: memref<27x128xbf16, #tpu.memory_space<vmem>>, %arg4: memref<12x128xbf16, #tpu.memory_space<vmem>>, %arg5: memref<1x128xf32, #tpu.memory_space<vmem>>, %arg6: memref<128x128xbf16, #tpu.memory_space<vmem>>, %arg7: memref<1x128xf32, #tpu.memory_space<vmem>>, %arg8: memref<1x128xf32, #tpu.memory_space<vmem>>, %arg9: memref<1x1xf32, #tpu.memory_space<vmem>>, %arg10: memref<8x1xf32, #tpu.memory_space<vmem>>) attributes {dimension_semantics = [#tpu.dimension_semantics<parallel>], iteration_bounds = array<i64: 1>, scalar_prefetch = 0 : i64, scratch_operands = 0 : i64, tpu.core_type = #tpu.core_type<tc>, window_params = [{transform_indices = @transform_0, window_bounds = array<i64: 8, 27>}, {transform_indices = @transform_1, window_bounds = array<i64: 8, 12>}, {pipeline_mode = #tpu.pipeline_mode<synchronous>, transform_indices = @transform_2, window_bounds = array<i64: 27, 128>}, {pipeline_mode = #tpu.pipeline_mode<synchronous>, transform_indices = @transform_3, window_bounds = array<i64: 12, 128>}, {pipeline_mode = #tpu.pipeline_mode<synchronous>, transform_indices = @transform_4, window_bounds = array<i64: 1, 128>}, {pipeline_mode = #tpu.pipeline_mode<synchronous>, transform_indices = @transform_5, window_bounds = array<i64: 128, 128>}, {pipeline_mode = #tpu.pipeline_mode<synchronous>, transform_indices = @transform_6, window_bounds = array<i64: 1, 128>}, {pipeline_mode = #tpu.pipeline_mode<synchronous>, transform_indices = @transform_7, window_bounds = array<i64: 1, 128>}, {pipeline_mode = #tpu.pipeline_mode<synchronous>, transform_indices = @transform_8, window_bounds = array<i64: 1, 1>}, {transform_indices = @transform_9, window_bounds = array<i64: 8, 1>}]} {
    %c0 = arith.constant 0 : index
    %c0_0 = arith.constant 0 : index
    %0 = vector.load %arg1[%c0, %c0_0] : memref<8x27xf32, #tpu.memory_space<vmem>>, vector<8x27xf32>
    %1 = arith.truncf %0 : vector<8x27xf32> to vector<8x27xbf16>
    %c0_1 = arith.constant 0 : index
    %c0_2 = arith.constant 0 : index
    %2 = vector.load %arg2[%c0_1, %c0_2] : memref<8x12xf32, #tpu.memory_space<vmem>>, vector<8x12xf32>
    %3 = arith.truncf %2 : vector<8x12xf32> to vector<8x12xbf16>
    %c0_3 = arith.constant 0 : index
    %c0_4 = arith.constant 0 : index
    %4 = vector.load %arg3[%c0_3, %c0_4] : memref<27x128xbf16, #tpu.memory_space<vmem>>, vector<27x128xbf16>
    %cst = arith.constant dense<0.000000e+00> : vector<8x128xf32>
    %5 = tpu.matmul %1, %4, %cst {dimension_numbers = #tpu.dot_dimension_numbers<[1], [0], [0], [1], [0, 0, 1, 1], [], []>} : vector<8x27xbf16>, vector<27x128xbf16>, vector<8x128xf32> -> vector<8x128xf32>
    %c0_5 = arith.constant 0 : index
    %c0_6 = arith.constant 0 : index
    %6 = vector.load %arg4[%c0_5, %c0_6] : memref<12x128xbf16, #tpu.memory_space<vmem>>, vector<12x128xbf16>
    %cst_7 = arith.constant dense<0.000000e+00> : vector<8x128xf32>
    %7 = tpu.matmul %3, %6, %cst_7 {dimension_numbers = #tpu.dot_dimension_numbers<[1], [0], [0], [1], [0, 0, 1, 1], [], []>} : vector<8x12xbf16>, vector<12x128xbf16>, vector<8x128xf32> -> vector<8x128xf32>
    %8 = arith.addf %5, %7 : vector<8x128xf32>
    %c0_8 = arith.constant 0 : index
    %c0_9 = arith.constant 0 : index
    %9 = vector.load %arg5[%c0_8, %c0_9] : memref<1x128xf32, #tpu.memory_space<vmem>>, vector<1x128xf32>
    %10 = vector.broadcast %9 : vector<1x128xf32> to vector<8x128xf32>
    %11 = arith.addf %8, %10 : vector<8x128xf32>
    %cst_10 = arith.constant 0.000000e+00 : f32
    %12 = vector.broadcast %cst_10 : f32 to vector<8x128xf32>
    %13 = arith.maximumf %11, %12 : vector<8x128xf32>
    %14 = arith.truncf %13 : vector<8x128xf32> to vector<8x128xbf16>
    %c0_11 = arith.constant 0 : index
    %c0_12 = arith.constant 0 : index
    %15 = vector.load %arg6[%c0_11, %c0_12] : memref<128x128xbf16, #tpu.memory_space<vmem>>, vector<128x128xbf16>
    %cst_13 = arith.constant dense<0.000000e+00> : vector<8x128xf32>
    %16 = tpu.matmul %14, %15, %cst_13 {dimension_numbers = #tpu.dot_dimension_numbers<[1], [0], [0], [1], [0, 0, 1, 1], [], []>} : vector<8x128xbf16>, vector<128x128xbf16>, vector<8x128xf32> -> vector<8x128xf32>
    %c0_14 = arith.constant 0 : index
    %c0_15 = arith.constant 0 : index
    %17 = vector.load %arg7[%c0_14, %c0_15] : memref<1x128xf32, #tpu.memory_space<vmem>>, vector<1x128xf32>
    %18 = vector.broadcast %17 : vector<1x128xf32> to vector<8x128xf32>
    %19 = arith.addf %16, %18 : vector<8x128xf32>
    %cst_16 = arith.constant 0.000000e+00 : f32
    %20 = vector.broadcast %cst_16 : f32 to vector<8x128xf32>
    %21 = arith.maximumf %19, %20 : vector<8x128xf32>
    %c0_17 = arith.constant 0 : index
    %c0_18 = arith.constant 0 : index
    %22 = vector.load %arg8[%c0_17, %c0_18] : memref<1x128xf32, #tpu.memory_space<vmem>>, vector<1x128xf32>
    %23 = vector.broadcast %22 : vector<1x128xf32> to vector<8x128xf32>
    %24 = arith.mulf %21, %23 : vector<8x128xf32>
    %cst_19 = arith.constant dense<0.000000e+00> : vector<8xf32>
    %25 = vector.multi_reduction <add>, %24, %cst_19 [1] : vector<8x128xf32> to vector<8xf32>
    %26 = vector.shape_cast %25 : vector<8xf32> to vector<8x1xf32>
    %c0_20 = arith.constant 0 : index
    %c0_21 = arith.constant 0 : index
    %27 = vector.load %arg9[%c0_20, %c0_21] : memref<1x1xf32, #tpu.memory_space<vmem>>, vector<1x1xf32>
    %28 = vector.extract %27[0, 0] : f32 from vector<1x1xf32>
    %29 = vector.broadcast %28 : f32 to vector<8x1xf32>
    %30 = arith.addf %26, %29 : vector<8x1xf32>
    %c0_22 = arith.constant 0 : index
    %c0_23 = arith.constant 0 : index
    %31 = vector.load %arg10[%c0_22, %c0_23] : memref<8x1xf32, #tpu.memory_space<vmem>>, vector<8x1xf32>
    tpu.vector_store %arg10[%c0_22, %c0_23], %30 {strides = array<i32>} : memref<8x1xf32, #tpu.memory_space<vmem>>, vector<8x1xf32>,
    return
  }
  func.func @transform_0(%arg0: i32) -> (i32, i32) {
    %c0_i32 = arith.constant 0 : i32
    %c0_i32_0 = arith.constant 0 : i32
    return %arg0, %c0_i32 : i32, i32
  }
  func.func @transform_1(%arg0: i32) -> (i32, i32) {
    %c0_i32 = arith.constant 0 : i32
    %c0_i32_0 = arith.constant 0 : i32
    return %arg0, %c0_i32 : i32, i32
  }
  func.func @transform_2(%arg0: i32) -> (i32, i32) {
    %c0_i32 = arith.constant 0 : i32
    %c0_i32_0 = arith.constant 0 : i32
    %c0_i32_1 = arith.constant 0 : i32
    return %c0_i32, %c0_i32_0 : i32, i32
  }
  func.func @transform_3(%arg0: i32) -> (i32, i32) {
    %c0_i32 = arith.constant 0 : i32
    %c0_i32_0 = arith.constant 0 : i32
    %c0_i32_1 = arith.constant 0 : i32
    return %c0_i32, %c0_i32_0 : i32, i32
  }
  func.func @transform_4(%arg0: i32) -> (i32, i32) {
    %c0_i32 = arith.constant 0 : i32
    %c0_i32_0 = arith.constant 0 : i32
    %c0_i32_1 = arith.constant 0 : i32
    return %c0_i32, %c0_i32_0 : i32, i32
  }
  func.func @transform_5(%arg0: i32) -> (i32, i32) {
    %c0_i32 = arith.constant 0 : i32
    %c0_i32_0 = arith.constant 0 : i32
    %c0_i32_1 = arith.constant 0 : i32
    return %c0_i32, %c0_i32_0 : i32, i32
  }
  func.func @transform_6(%arg0: i32) -> (i32, i32) {
    %c0_i32 = arith.constant 0 : i32
    %c0_i32_0 = arith.constant 0 : i32
    %c0_i32_1 = arith.constant 0 : i32
    return %c0_i32, %c0_i32_0 : i32, i32
  }
  func.func @transform_7(%arg0: i32) -> (i32, i32) {
    %c0_i32 = arith.constant 0 : i32
    %c0_i32_0 = arith.constant 0 : i32
    %c0_i32_1 = arith.constant 0 : i32
    return %c0_i32, %c0_i32_0 : i32, i32
  }
  func.func @transform_8(%arg0: i32) -> (i32, i32) {
    %c0_i32 = arith.constant 0 : i32
    %c0_i32_0 = arith.constant 0 : i32
    %c0_i32_1 = arith.constant 0 : i32
    return %c0_i32, %c0_i32_0 : i32, i32
  }
  func.func @transform_9(%arg0: i32) -> (i32, i32) {
    %c0_i32 = arith.constant 0 : i32
    %c0_i32_0 = arith.constant 0 : i32
    return %arg0, %c0_i32 : i32, i32
  }
}

</mosaic_0001>

<bundles_post_ra>
// kernel: critic_forward.1
= control target key start
LH: loop header
LB: loop body
LE: loop exit
PB: predicated region body
PF: predicated region fallthrough
CT: control target
= control target key end

     0   :  { %s513_s0 = inlined_call_operand.vmem [shape: f32[8,27], index: 0, kind: input, shape index: {}]   ;;  %s514_s1 = inlined_call_operand.vmem [shape: f32[8,12], index: 1, kind: input, shape index: {}]   ;;  %s515_s2 = inlined_call_operand.vmem [shape: bf16[27,128], index: 2, kind: input, shape index: {}]   ;;  %s516_s3 = inlined_call_operand.vmem [shape: bf16[12,128], index: 3, kind: input, shape index: {}]   ;;  %s517_s4 = inlined_call_operand.vmem [shape: f32[1,128], index: 4, kind: input, shape index: {}]   ;;  %s518_s5 = inlined_call_operand.hbm [shape: bf16[128,128], index: 5, kind: input, shape index: {}]   ;;  %s519_s6 = inlined_call_operand.vmem [shape: f32[1,128], index: 6, kind: input, shape index: {}]   ;;  %s520_s7 = inlined_call_operand.vmem [shape: f32[1,128], index: 7, kind: input, shape index: {}]   ;;  %s521_s8 = inlined_call_operand.<no memory space> [shape: f32[1,1], index: 8, kind: input, shape index: {}]   ;;  %s522_s9 = inlined_call_operand.vmem [shape: f32[8,1], index: 9, kind: output, shape index: {}]  }
   0x1   :  { %v14_v0 = vstv %s521_s8 }
   0x2   :  { %15 = vst [vmem:[#allocation2] sm:$0x1] %v14_v0 }
   0x3   :  { %16 = vsyncpa [#allocation4], 0  ;;  %s421_s11 = smov [#allocation3]  }
   0x4   :  { %s32_s12 = sshll.u32 %s421_s11, 4  ;;  %s33_s12 = int_to_ptr.vmem [resolvable:$true] %s32_s12 }
   0x5   :  { %s407_s13 = scalar_lea.vmem %s33_s12, 1024  ;;  %p412_p1 = scmp.lt.s32.totalorder %s33_s12, %s33_s12 }
   0x6   :  { %p408_p0 = scmp.ne.s32.totalorder %s33_s12, %s407_s13  ;;  %p413_p2 = scmp.lt.s32.totalorder %s407_s13, %s407_s13 }
   0x8   :  { %p414_p3 = por %p413_p2, %p412_p1 }
   0xa   :  { %p415_p4 = pnand %p414_p3, %p408_p0 }
   0xc   :  { %418 = shalt.err (!%p415_p4)
}
   0xd   :  { %s422_s14 = smov 64   ;;  %s423_s15 = smov 4  }
   0xe   :  { %38 = dma.hbm_to_vmem [thread:$0]  %s518_s5, 1024, %s33_s12, [#allocation4], %s422_s14, %s422_s14, %s423_s15  }
   0xf   :  { %419 = dma.done.wait [#allocation4], 1024  }
  0x10   :  { %420 = vsyncadd [#allocation4], 4294966272  ;;  %vm127_vm0 = vcmask 1044480   ;;  %v424_v1 = vmov 0.0   ;;  %vm425_vm1 = vmmov 0   ;;  %v426_v2 = vmov 65535  }
  0x11   :  { %346 = vmatprep.subr.bf16.mxu1 %v424_v1  ;;  %360 = vmatprep.subr.bf16.mxu0 %v424_v1  ;;  %v128_v3 = vsel %vm127_vm0, 4294967295, %v426_v2  ;;  %vm68_vm2 = vcmask 1045504   ;;  %v388_v5 = vld [vmem:[%s516_s3] sm:$0x3f]   ;;  %v389_v6 = vld [vmem:[%s515_s2 + $0x8] sm:$0x3f]  }
  0x12   :  { %348 = vmatprep.mubr.msk.bf16.mxu1 %vm425_vm1, %v424_v1  ;;  %376 = vmatprep.mubr.msk.bf16.mxu0 %vm425_vm1, %v424_v1  ;;  %v129_v4 = vsel %vm68_vm2, %v128_v3, 0  ;;  %v51_v7 = vld [vmem:[%s514_s1] sm:$0xff]  ;;  %v70_v8 = vsel %vm68_vm2, %v388_v5, 0  ;;  %vm64_vm3 = vcmask 97280   ;;  %v392_v13 = vld [vmem:[#allocation3 + $0x30] sm:$0xff]   ;;  %v393_v15 = vld [vmem:[#allocation3 + $0x28] sm:$0xff]  }
  0x13   :  { %v52_v9 = vpack.c.bf16 %v51_v7, %v51_v7  ;;  %347 = vmatpush3.bf16.msra.mxu1 %v70_v8  ;;  %v131_v10 = vand.u32 %v389_v6, %v129_v4  ;;  %v391_v11 = vld [vmem:[#allocation3 + $0x38] sm:$0xff]   ;;  %vm123_vm4 = vcmask 220160   ;;  %v394_v17 = vld [vmem:[#allocation3 + $0x20] sm:$0xff]   ;;  %v396_v19 = vld [vmem:[#allocation3 + $0x10] sm:$0xff]   ;;  %vm309_vm5 = vcmask 7168  }
  0x14   :  { %352 = vmatprep.subr.bf16.mxu1 %v424_v1  ;;  %v390_v12 = vld [vmem:[%s515_s2] sm:$0xff]   ;;  %361 = vmatpush3.bf16.msra.mxu0 %v391_v11  ;;  %v397_v20 = vld [vmem:[#allocation3 + $0x8] sm:$0xff]  }
  0x15   :  { %v49_v14 = vld [vmem:[%s513_s0] sm:$0xff]  ;;  %362 = vmatprep.subr.bf16.mxu0 %v424_v1 }
  0x16   :  { %349 = vmatmul.mubr.msk.bf16.vlgmr.msra.gmra.mxu1 %vm64_vm3, %v52_v9  ;;  %v50_v16 = vpack.c.bf16 %v49_v14, %v49_v14  ;;  %v395_v18 = vld [vmem:[#allocation3 + $0x18] sm:$0xff]   ;;  %v398_v21 = vld [vmem:[#allocation3] sm:$0xff]  }
  0x17   :  { %353 = vmatpush3.bf16.msra.mxu1 %v131_v10  ;;  %356 = vmatprep.mubr.msk.bf16.mxu1 %vm425_vm1, %v424_v1  ;;  %v321_v27 = vld [vmem:[%s517_s4] ss:$0 sm:$0xff] }
  0x18   :  { %354 = vmatprep.subr.bf16.mxu1 %v424_v1  ;;  %363 = vmatpush3.bf16.msra.mxu0 %v392_v13  ;;  %v305_v35 = vld [vmem:[#allocation2] sm:$0x1] }
  0x19   :  { %364 = vmatprep.subr.bf16.mxu0 %v424_v1  ;;  %380 = vpush %v305_v35  ;;  %v322_v36 = vld [vmem:[%s519_s6] ss:$0 sm:$0xff] }
  0x1a   :  { %v331_v40 = vld [vmem:[%s520_s7] ss:$0 sm:$0xff] }
  0x1b   :  { %355 = vmatpush3.bf16.msra.mxu1 %v390_v12 }
  0x1c   :  { %365 = vmatpush3.bf16.msra.mxu0 %v393_v15 }
  0x1d   :  { %366 = vmatprep.subr.bf16.mxu0 %v424_v1 }
  0x1e   :  { %357 = vmatmul.mubr.msk.bf16.vlgmr.msra.gmra.mxu1 %vm123_vm4, %v50_v16 }
  0x20   :  { %367 = vmatpush3.bf16.msra.mxu0 %v394_v17 }
  0x21   :  { %368 = vmatprep.subr.bf16.mxu0 %v424_v1 }
  0x24   :  { %369 = vmatpush3.bf16.msra.mxu0 %v395_v18 }
  0x25   :  { %370 = vmatprep.subr.bf16.mxu0 %v424_v1 }
  0x28   :  { %371 = vmatpush3.bf16.msra.mxu0 %v396_v19 }
  0x29   :  { %372 = vmatprep.subr.bf16.mxu0 %v424_v1 }
  0x2c   :  { %373 = vmatpush3.bf16.msra.mxu0 %v397_v20 }
  0x2d   :  { %374 = vmatprep.subr.bf16.mxu0 %v424_v1 }
  0x30   :  { %375 = vmatpush3.bf16.msra.mxu0 %v398_v21 }
  0x4a   :  { %s381_s4 = spop %380 }
  0x4b   :  { %v307_v45 = vstv %s381_s4 }
  0xd6   :  { %v106_v22 = vpop.f32.mrf.mxu1 }
  0xd8   :  { %v350_v23 = vpop.f32.mrf.mxu1 }
  0xda   :  { %v109_v24 = vpop.f32.mrf.mxu1 }
  0xdc   :  { %v351_v25 = vpop.f32.mrf.mxu1 }
  0xde   :  { %v167_v26 = vpop.f32.mrf.mxu1 }
  0xdf   :  { %v168_v28 = vadd.f32 %v167_v26, %v106_v22 }
  0xe0   :  { %v358_v29 = vpop.f32.mrf.mxu1 }
  0xe1   :  { %v180_v30 = vadd.f32 %v321_v27, %v168_v28 }
  0xe2   :  { %v170_v31 = vpop.f32.mrf.mxu1 }
  0xe3   :  { %v181_v32 = vmax.f32 %v180_v30, 0.0 }
  0xe4   :  { %v359_v33 = vpop.f32.mrf.mxu1 }
  0xe5   :  { %v182_v34 = vpack.c.bf16 %v181_v32, %v181_v32 }
  0xe7   :  { %377 = vmatmul.mubr.bf16.vlgmr.msra.gmra.mxu0 %v182_v34 }
 0x1a7   :  { %v288_v37 = vpop.f32.mrf.mxu0 }
 0x1a8   :  { %v289_v38 = vadd.f32 %v322_v36, %v288_v37 }
 0x1a9   :  { %v378_v39 = vpop.f32.mrf.mxu0 }
 0x1aa   :  { %v294_v41 = vmax.f32 %v289_v38, 0.0 }
 0x1ab   :  { %v291_v42 = vpop.f32.mrf.mxu0 }
 0x1ac   :  { %v302_v43 = vmul.f32 %v331_v40, %v294_v41 }
 0x1ad   :  { %v379_v44 = vpop.f32.mrf.mxu0 }
 0x1ae   :  { %303 = vadd.xlane.f32.xlu0 %v302_v43 }
 0x237   :  { %v304_v46 = vpop.xlane.xlu0 %303 }
 0x238   :  { %v308_v47 = vadd.f32 %v307_v45, %v304_v46 }
 0x23a   :  { %310 = vst.msk [vmem:[%s522_s9] sm:$0xff] %vm309_vm5, %v308_v47 }
 0x23b   :  { %315 = vsyncpa [#allocation4], 1 }

</bundles_post_ra>
